<compile_context>
chip_gen: v5e
topology: v5e:2x2
jax: 0.10.0
libtpu: 0.0.40
codegen_flags: <defaults>
</compile_context>

<pallas_src>
import functools

import jax
import jax.numpy as jnp
from jax.experimental import pallas as pl
from jax.experimental.pallas import tpu as pltpu


def _sage_kernel(x_ref, neigh_ref, wl_ref, wr_ref, o_ref):
    # x_ref:     (tile_n, F)
    # neigh_ref: (tile_n, K*F)   -- lane-dense, K-mean folded into wr_ref
    # wl_ref:    (F, O)
    # wr_ref:    (K*F, O)        -- tiled & pre-scaled by 1/K (mean) or 1 (sum)
    xl = jnp.dot(x_ref[...], wl_ref[...], preferred_element_type=jnp.float32)
    xr = jnp.dot(neigh_ref[...], wr_ref[...], preferred_element_type=jnp.float32)
    o_ref[...] = (xl + xr).astype(o_ref.dtype)


@functools.partial(jax.jit, static_argnames=("tile_n", "aggr"))
def sage_aggregator(x, neigh_x, w_l, w_r, *, tile_n=512, aggr="mean"):
    """SAGE 'mean'/'sum' aggregation + dual linear projection.

    x:       [N, F]
    neigh_x: [N, K, F]
    w_l/w_r: [F, O]  (PyTorch nn.Linear weight, already transposed)
    returns: [N, O]
    """
    N, F = x.shape
    _, K, _ = neigh_x.shape
    O = w_l.shape[1]

    # --- Fold the K-reduction into the MXU -------------------------------
    # [N, K, F] -> [N, K*F] is a free row-major reshape; the matching weight
    # stacks W_r K times along the contraction axis, pre-scaled for 'mean'.
    neigh_flat = neigh_x.reshape(N, K * F)
    scale = (1.0 / K) if aggr == "mean" else 1.0
    w_r_rep = (jnp.tile(w_r, (K, 1)) * jnp.asarray(scale, w_r.dtype)).astype(w_r.dtype)

    # --- Tile selection ---------------------------------------------------
    # Large tiles amortize per-step overhead; cap so the parallel grid axis
    # still has >=2 steps (keeps both v7x TensorCores busy) and keep the tile
    # sublane-aligned (multiple of 8).
    tn = min(tile_n, max(8, N // 2 if N >= 16 else N))
    tn = max(8, (tn // 8) * 8)
    grid_n = pl.cdiv(N, tn)
    n_pad = grid_n * tn

    if n_pad != N:
        # Zero padding: padded rows produce zeros and are sliced off below.
        x = jnp.pad(x, ((0, n_pad - N), (0, 0)))
        neigh_flat = jnp.pad(neigh_flat, ((0, n_pad - N), (0, 0)))

    out = pl.pallas_call(
        _sage_kernel,
        out_shape=jax.ShapeDtypeStruct((n_pad, O), x.dtype),
        grid_spec=pltpu.PrefetchScalarGridSpec(
            num_scalar_prefetch=0,
            grid=(grid_n,),
            in_specs=[
                pl.BlockSpec((tn, F), lambda i: (i, 0)),
                pl.BlockSpec((tn, K * F), lambda i: (i, 0)),
                # Weights: constant index_map -> resident across grid steps.
                pl.BlockSpec((F, O), lambda i: (0, 0)),
                pl.BlockSpec((K * F, O), lambda i: (0, 0)),
            ],
            out_specs=pl.BlockSpec((tn, O), lambda i: (i, 0)),
        ),
        compiler_params=pltpu.CompilerParams(
            dimension_semantics=("parallel",),
        ),
    )(x, neigh_flat, w_l, w_r_rep)

    return out[:N]


def sage_reference(x, neigh_x, w_l, w_r, aggr="mean"):
    red = jnp.mean if aggr == "mean" else jnp.sum
    neigh = red(neigh_x, axis=1)
    return x @ w_l + neigh @ w_r


if __name__ == "__main__":
    key = jax.random.PRNGKey(0)
    k1, k2, k3, k4 = jax.random.split(key, 4)

    N, K, F, O = 128, 8, 32, 64  # nodes, neighbors-per-node, in_features, out_features

    x = jax.random.normal(k1, (N, F), dtype=jnp.float32)
    neigh_x = jax.random.normal(k2, (N, K, F), dtype=jnp.float32)

    # Deterministic parameter init (mimics PyTorch Linear uniform(-1/sqrt(F), 1/sqrt(F))).
    bound = 1.0 / jnp.sqrt(jnp.float32(F))
    w_l = jax.random.uniform(k3, (F, O), minval=-bound, maxval=bound, dtype=jnp.float32)
    w_r = jax.random.uniform(k4, (F, O), minval=-bound, maxval=bound, dtype=jnp.float32)

    out = sage_aggregator(x, neigh_x, w_l, w_r)
    out = jax.block_until_ready(out)

    ref = sage_reference(x, neigh_x, w_l, w_r)
    assert out.shape == (N, O)
    assert jnp.allclose(out, ref, atol=1e-4, rtol=1e-4)

    # Ragged-N path (padding + slice) sanity check.
    out_ragged = jax.block_until_ready(
        sage_aggregator(x[:100], neigh_x[:100], w_l, w_r)
    )
    assert jnp.allclose(out_ragged, sage_reference(x[:100], neigh_x[:100], w_l, w_r),
                        atol=1e-4, rtol=1e-4)

    print("KERNEL_OK")
</pallas_src>

<mosaic_0001>
module attributes {stable_mosaic.version = 11 : i64} {
  func.func @_sage_kernel(%arg0: i32, %arg1: memref<64x32xf32, #tpu.memory_space<vmem>>, %arg2: memref<64x256xf32, #tpu.memory_space<vmem>>, %arg3: memref<32x64xf32, #tpu.memory_space<vmem>>, %arg4: memref<256x64xf32, #tpu.memory_space<vmem>>, %arg5: memref<64x64xf32, #tpu.memory_space<vmem>>) attributes {dimension_semantics = [#tpu.dimension_semantics<parallel>], iteration_bounds = array<i64: 2>, scalar_prefetch = 0 : i64, scratch_operands = 0 : i64, tpu.core_type = #tpu.core_type<tc>, window_params = [{transform_indices = @transform_0, window_bounds = array<i64: 64, 32>}, {transform_indices = @transform_1, window_bounds = array<i64: 64, 256>}, {pipeline_mode = #tpu.pipeline_mode<synchronous>, transform_indices = @transform_2, window_bounds = array<i64: 32, 64>}, {pipeline_mode = #tpu.pipeline_mode<synchronous>, transform_indices = @transform_3, window_bounds = array<i64: 256, 64>}, {transform_indices = @transform_4, window_bounds = array<i64: 64, 64>}]} {
    %c0 = arith.constant 0 : index
    %c0_0 = arith.constant 0 : index
    %0 = vector.load %arg1[%c0, %c0_0] : memref<64x32xf32, #tpu.memory_space<vmem>>, vector<64x32xf32>
    %c0_1 = arith.constant 0 : index
    %c0_2 = arith.constant 0 : index
    %1 = vector.load %arg3[%c0_1, %c0_2] : memref<32x64xf32, #tpu.memory_space<vmem>>, vector<32x64xf32>
    %cst = arith.constant dense<0.000000e+00> : vector<64x64xf32>
    %2 = tpu.matmul %0, %1, %cst {dimension_numbers = #tpu.dot_dimension_numbers<[1], [0], [0], [1], [0, 0, 1, 1], [], []>} : vector<64x32xf32>, vector<32x64xf32>, vector<64x64xf32> -> vector<64x64xf32>
    %c0_3 = arith.constant 0 : index
    %c0_4 = arith.constant 0 : index
    %3 = vector.load %arg2[%c0_3, %c0_4] : memref<64x256xf32, #tpu.memory_space<vmem>>, vector<64x256xf32>
    %c0_5 = arith.constant 0 : index
    %c0_6 = arith.constant 0 : index
    %4 = vector.load %arg4[%c0_5, %c0_6] : memref<256x64xf32, #tpu.memory_space<vmem>>, vector<256x64xf32>
    %cst_7 = arith.constant dense<0.000000e+00> : vector<64x64xf32>
    %5 = tpu.matmul %3, %4, %cst_7 {dimension_numbers = #tpu.dot_dimension_numbers<[1], [0], [0], [1], [0, 0, 1, 1], [], []>} : vector<64x256xf32>, vector<256x64xf32>, vector<64x64xf32> -> vector<64x64xf32>
    %6 = arith.addf %2, %5 : vector<64x64xf32>
    %c0_8 = arith.constant 0 : index
    %c0_9 = arith.constant 0 : index
    %7 = vector.load %arg5[%c0_8, %c0_9] : memref<64x64xf32, #tpu.memory_space<vmem>>, vector<64x64xf32>
    tpu.vector_store %arg5[%c0_8, %c0_9], %6 {strides = array<i32>} : memref<64x64xf32, #tpu.memory_space<vmem>>, vector<64x64xf32>,
    return
  }
  func.func @transform_0(%arg0: i32) -> (i32, i32) {
    %c0_i32 = arith.constant 0 : i32
    %c0_i32_0 = arith.constant 0 : i32
    return %arg0, %c0_i32 : i32, i32
  }
  func.func @transform_1(%arg0: i32) -> (i32, i32) {
    %c0_i32 = arith.constant 0 : i32
    %c0_i32_0 = arith.constant 0 : i32
    return %arg0, %c0_i32 : i32, i32
  }
  func.func @transform_2(%arg0: i32) -> (i32, i32) {
    %c0_i32 = arith.constant 0 : i32
    %c0_i32_0 = arith.constant 0 : i32
    %c0_i32_1 = arith.constant 0 : i32
    return %c0_i32, %c0_i32_0 : i32, i32
  }
  func.func @transform_3(%arg0: i32) -> (i32, i32) {
    %c0_i32 = arith.constant 0 : i32
    %c0_i32_0 = arith.constant 0 : i32
    %c0_i32_1 = arith.constant 0 : i32
    return %c0_i32, %c0_i32_0 : i32, i32
  }
  func.func @transform_4(%arg0: i32) -> (i32, i32) {
    %c0_i32 = arith.constant 0 : i32
    %c0_i32_0 = arith.constant 0 : i32
    return %arg0, %c0_i32 : i32, i32
  }
}

</mosaic_0001>

<bundles_post_ra>
// kernel: sage_aggregator.1
= control target key start
LH: loop header
LB: loop body
LE: loop exit
PB: predicated region body
PF: predicated region fallthrough
CT: control target
= control target key end

     0   :  { %s607_s15 = smov 0   ;;  %s845_s0 = inlined_call_operand.vmem [shape: f32[128,32], index: 0, kind: input, shape index: {}]   ;;  %s846_s1 = inlined_call_operand.vmem [shape: f32[128,256], index: 1, kind: input, shape index: {}]   ;;  %s847_s2 = inlined_call_operand.vmem [shape: f32[32,64], index: 2, kind: input, shape index: {}]   ;;  %s848_s3 = inlined_call_operand.vmem [shape: f32[256,64], index: 3, kind: input, shape index: {}]   ;;  %s849_s4 = inlined_call_operand.vmem [shape: f32[128,64], index: 4, kind: output, shape index: {}]  }
   0x1 LB: > { %s511_s16 = sadd.s32 4294967295, %s580_s15   ;;  %p515_p0 = scmp.ge.s32.totalorder %s580_s15, 1  ;;  %s580_s15 = sphi %s607_s15, %s14_s15  }
   0x2   : > { %p175_p1 = scmp.lt.s32.totalorder %s580_s15, 3 }
   0x4   : > { %p176_p2 = pnand %p515_p0, %p175_p1 }
   0x5   : > { %s516_s23 = sshll.u32 (!%p176_p2), %s511_s16, 3 }
   0x6   : > { %179 = sbr.rel (%p176_p2) target bundleno = 220 (0xdc), region = 36  ;;  %p208_p3 = scmp.lt.s32.totalorder (!%p176_p2), %s516_s23, 15 }
   0xb   : > { %v269_v0 = vld [vmem:[%s848_s3 + $0x78] sm:$0xff]  ;;  %v268_v2 = vld [vmem:[%s848_s3 + $0x70] sm:$0xff]  ;;  %v267_v4 = vld [vmem:[%s848_s3 + $0x68] sm:$0xff]  ;;  %s851_s23 = smov (!%p208_p3, %s516_s23), 15  ;;  %vm368_vm0 = vcmask 261120   ;;  %vm434_vm1 = vcmask 523264  }
   0xc   : > { %v621_v1 = vld [vmem:[%s848_s3 + $0xf8] sm:$0xff]  ;;  %286 = vmatpush.msra.mxu0 %v269_v0  ;;  %534 = vmatpush.msra.mxu3 %v269_v0  ;;  %v629_v3 = vld [vmem:[%s848_s3 + $0xf0] sm:$0xff]  ;;  %v638_v5 = vld [vmem:[%s848_s3 + $0xe8] sm:$0xff]  ;;  %s517_s14 = sshll.u32 %s851_s23, 3  ;;  %s533_s8 = sshll.u32 %s851_s23, 4 }
   0xd   : > { %327 = vmatpush.msra.mxu1 %v621_v1  ;;  %v237_v6 = vld [vmem:[%s847_s2 + $0x18] sm:$0xff]  ;;  %v266_v7 = vld [vmem:[%s848_s3 + $0x60] sm:$0xff]  ;;  %v236_v8 = vld [vmem:[%s847_s2 + $0x10] sm:$0xff]  ;;  %s670_s20 = scalar_lea.vmem %s845_s0, %s517_s14  ;;  %s766_s19 = scalar_lea.vmem %s846_s1, %s533_s8 }
   0xe   : > { %287 = vmatpush.msra.mxu0 %v268_v2  ;;  %535 = vmatpush.msra.mxu3 %v268_v2  ;;  %v655_v9 = vld [vmem:[%s848_s3 + $0xe0] sm:$0xff]  ;;  %v235_v10 = vld [vmem:[%s847_s2 + $0x8] sm:$0xff]  ;;  %v265_v11 = vld [vmem:[%s848_s3 + $0x58] sm:$0xff]  ;;  %s824_s6 = scalar_lea.vmem %s849_s4, %s517_s14 }
   0xf   : > { %328 = vmatpush.msra.mxu1 %v629_v3  ;;  %405 = vmatpush.msra.mxu2 %v237_v6  ;;  %v675_v12 = vld [vmem:[%s848_s3 + $0xd8] sm:$0xff]  ;;  %v234_v13 = vld [vmem:[%s847_s2] sm:$0xff]  ;;  %v264_v14 = vld [vmem:[%s848_s3 + $0x50] sm:$0xff] }
  0x10   : > { %288 = vmatpush.msra.mxu0 %v267_v4  ;;  %536 = vmatpush.msra.mxu3 %v267_v4  ;;  %v687_v15 = vld [vmem:[%s848_s3 + $0xd0] sm:$0xff]  ;;  %v226_v16 = vld [vmem:[%s670_s20] sm:$0xff]  ;;  %v263_v17 = vld [vmem:[%s848_s3 + $0x48] sm:$0xff] }
  0x11   : > { %329 = vmatpush.msra.mxu1 %v638_v5  ;;  %406 = vmatpush.msra.mxu2 %v236_v8  ;;  %v697_v18 = vld [vmem:[%s848_s3 + $0xc8] sm:$0xff]  ;;  %v262_v19 = vld [vmem:[%s848_s3 + $0x40] sm:$0xff]  ;;  %v261_v21 = vld [vmem:[%s848_s3 + $0x38] sm:$0xff] }
  0x12   : > { %289 = vmatpush.msra.mxu0 %v266_v7  ;;  %537 = vmatpush.msra.mxu3 %v266_v7  ;;  %v707_v20 = vld [vmem:[%s848_s3 + $0xc0] sm:$0xff]  ;;  %v716_v22 = vld [vmem:[%s848_s3 + $0xb8] sm:$0xff]  ;;  %v260_v23 = vld [vmem:[%s848_s3 + $0x30] sm:$0xff] }
  0x13   : > { %330 = vmatpush.msra.mxu1 %v655_v9  ;;  %407 = vmatpush.msra.mxu2 %v235_v10  ;;  %v725_v24 = vld [vmem:[%s848_s3 + $0xb0] sm:$0xff]  ;;  %v227_v25 = vld [vmem:[%s670_s20 + $0x8] sm:$0xff]  ;;  %v258_v28 = vld [vmem:[%s848_s3 + $0x20] sm:$0xff] }
  0x14   : > { %290 = vmatpush.msra.mxu0 %v265_v11  ;;  %538 = vmatpush.msra.mxu3 %v265_v11  ;;  %v259_v26 = vld [vmem:[%s848_s3 + $0x28] sm:$0xff]  ;;  %v745_v29 = vld [vmem:[%s848_s3 + $0xa0] sm:$0xff]  ;;  %v257_v30 = vld [vmem:[%s848_s3 + $0x18] sm:$0xff] }
  0x15   : > { %331 = vmatpush.msra.mxu1 %v675_v12  ;;  %408 = vmatpush.msra.mxu2 %v234_v13  ;;  %v735_v27 = vld [vmem:[%s848_s3 + $0xa8] sm:$0xff]  ;;  %v273_v31 = vld [vmem:[%s848_s3 + $0x98] sm:$0xff]  ;;  %v256_v32 = vld [vmem:[%s848_s3 + $0x10] sm:$0xff] }
  0x16   : > { %291 = vmatpush.msra.mxu0 %v264_v14  ;;  %539 = vmatpush.msra.mxu3 %v264_v14  ;;  %v272_v33 = vld [vmem:[%s848_s3 + $0x90] sm:$0xff]  ;;  %v255_v35 = vld [vmem:[%s848_s3 + $0x8] sm:$0xff]  ;;  %v254_v37 = vld [vmem:[%s848_s3] sm:$0xff] }
  0x17   : > { %332 = vmatpush.msra.mxu1 %v687_v15  ;;  %523 = vmatmul.msk.f32.vlgmr.msra.gmra.mxu2 %vm368_vm0, %v226_v16  ;;  %v228_v34 = vld [vmem:[%s670_s20 + $0x10] sm:$0xff]  ;;  %v271_v36 = vld [vmem:[%s848_s3 + $0x88] sm:$0xff]  ;;  %v270_v38 = vld [vmem:[%s848_s3 + $0x80] sm:$0xff] }
  0x18   : > { %292 = vmatpush.msra.mxu0 %v263_v17  ;;  %540 = vmatpush.msra.mxu3 %v263_v17  ;;  %v238_v39 = vld [vmem:[%s766_s19] sm:$0xff]  ;;  %v239_v40 = vld [vmem:[%s766_s19 + $0x8] sm:$0xff]  ;;  %v229_v42 = vld [vmem:[%s670_s20 + $0x18] sm:$0xff] }
  0x19   : > { %333 = vmatpush.msra.mxu1 %v697_v18  ;;  %v250_v41 = vld [vmem:[%s766_s19 + $0x60] sm:$0xff]  ;;  %v240_v43 = vld [vmem:[%s766_s19 + $0x10] sm:$0xff]  ;;  %v241_v44 = vld [vmem:[%s766_s19 + $0x18] sm:$0xff] }
  0x1a   : > { %293 = vmatpush.msra.mxu0 %v262_v19  ;;  %541 = vmatpush.msra.mxu3 %v262_v19  ;;  %v252_v45 = vld [vmem:[%s766_s19 + $0x70] sm:$0xff]  ;;  %v230_v46 = vld [vmem:[%s670_s20 + $0x20] sm:$0xff]  ;;  %v243_v48 = vld [vmem:[%s766_s19 + $0x28] sm:$0xff] }
  0x1b   : > { %334 = vmatpush.msra.mxu1 %v707_v20  ;;  %v242_v47 = vld [vmem:[%s766_s19 + $0x20] sm:$0xff]  ;;  %v231_v49 = vld [vmem:[%s670_s20 + $0x28] sm:$0xff]  ;;  %v244_v50 = vld [vmem:[%s766_s19 + $0x30] sm:$0xff] }
  0x1c   : > { %294 = vmatpush.msra.mxu0 %v261_v21  ;;  %542 = vmatpush.msra.mxu3 %v261_v21  ;;  %v245_v51 = vld [vmem:[%s766_s19 + $0x38] sm:$0xff]  ;;  %v232_v52 = vld [vmem:[%s670_s20 + $0x30] sm:$0xff]  ;;  %v251_v53 = vld [vmem:[%s766_s19 + $0x68] sm:$0xff] }
  0x1d   : > { %335 = vmatpush.msra.mxu1 %v716_v22  ;;  %v246_v54 = vld [vmem:[%s766_s19 + $0x40] sm:$0xff]  ;;  %v247_v55 = vld [vmem:[%s766_s19 + $0x48] sm:$0xff]  ;;  %v233_v56 = vld [vmem:[%s670_s20 + $0x38] sm:$0xff] }
  0x1e   : > { %295 = vmatpush.msra.mxu0 %v260_v23  ;;  %543 = vmatpush.msra.mxu3 %v260_v23  ;;  %v253_v57 = vld [vmem:[%s766_s19 + $0x78] sm:$0xff]  ;;  %v248_v58 = vld [vmem:[%s766_s19 + $0x50] sm:$0xff] }
  0x1f   : > { %336 = vmatpush.msra.mxu1 %v725_v24  ;;  %524 = vmatmul.msk.f32.gmra.mxu2 %vm368_vm0, %v227_v25  ;;  %v249_v59 = vld [vmem:[%s766_s19 + $0x58] sm:$0xff] }
  0x20   : > { %296 = vmatpush.msra.mxu0 %v259_v26  ;;  %544 = vmatpush.msra.mxu3 %v259_v26 }
  0x21   : > { %337 = vmatpush.msra.mxu1 %v735_v27 }
  0x22   : > { %297 = vmatpush.msra.mxu0 %v258_v28  ;;  %545 = vmatpush.msra.mxu3 %v258_v28 }
  0x23   : > { %338 = vmatpush.msra.mxu1 %v745_v29 }
  0x24   : > { %298 = vmatpush.msra.mxu0 %v257_v30  ;;  %546 = vmatpush.msra.mxu3 %v257_v30 }
  0x25   : > { %339 = vmatpush.msra.mxu1 %v273_v31 }
  0x26   : > { %299 = vmatpush.msra.mxu0 %v256_v32  ;;  %547 = vmatpush.msra.mxu3 %v256_v32 }
  0x27   : > { %340 = vmatpush.msra.mxu1 %v272_v33  ;;  %525 = vmatmul.msk.f32.gmra.mxu2 %vm368_vm0, %v228_v34 }
  0x28   : > { %300 = vmatpush.msra.mxu0 %v255_v35  ;;  %548 = vmatpush.msra.mxu3 %v255_v35 }
  0x29   : > { %341 = vmatpush.msra.mxu1 %v271_v36 }
  0x2a   : > { %301 = vmatpush.msra.mxu0 %v254_v37  ;;  %549 = vmatpush.msra.mxu3 %v254_v37 }
  0x2b   : > { %342 = vmatpush.msra.mxu1 %v270_v38  ;;  %302 = vmatmul.f32.vlgmr.msra.gmra.mxu0 %v238_v39 }
  0x2c   : > { %550 = vmatpush.msrb.mxu3 %v621_v1  ;;  %343 = vmatmul.f32.vlgmr.msra.gmra.mxu1 %v239_v40 }
  0x2d   : > { %320 = vmatmul.f32.vlgmr.msra.gmra.mxu3 %v250_v41 }
  0x2e   : > { %551 = vmatpush.msrb.mxu3 %v629_v3 }
  0x2f   : > { %526 = vmatmul.msk.f32.gmra.mxu2 %vm368_vm0, %v229_v42 }
  0x30   : > { %552 = vmatpush.msrb.mxu3 %v638_v5 }
  0x32   : > { %553 = vmatpush.msrb.mxu3 %v655_v9 }
  0x33   : > { %305 = vmatmul.f32.gmra.mxu0 %v240_v43 }
  0x34   : > { %554 = vmatpush.msrb.mxu3 %v675_v12  ;;  %346 = vmatmul.f32.gmra.mxu1 %v241_v44 }
  0x35   : > { %323 = vmatmul.f32.gmra.mxu3 %v252_v45 }
  0x36   : > { %555 = vmatpush.msrb.mxu3 %v687_v15 }
  0x37   : > { %527 = vmatmul.msk.f32.gmra.mxu2 %vm368_vm0, %v230_v46 }
  0x38   : > { %556 = vmatpush.msrb.mxu3 %v697_v18 }
  0x3a   : > { %557 = vmatpush.msrb.mxu3 %v707_v20 }
  0x3b   : > { %308 = vmatmul.f32.gmra.mxu0 %v242_v47 }
  0x3c   : > { %558 = vmatpush.msrb.mxu3 %v716_v22  ;;  %349 = vmatmul.f32.gmra.mxu1 %v243_v48 }
  0x3e   : > { %559 = vmatpush.msrb.mxu3 %v725_v24 }
  0x3f   : > { %528 = vmatmul.msk.f32.gmra.mxu2 %vm368_vm0, %v231_v49 }
  0x40   : > { %560 = vmatpush.msrb.mxu3 %v735_v27 }
  0x42   : > { %561 = vmatpush.msrb.mxu3 %v745_v29 }
  0x43   : > { %311 = vmatmul.f32.gmra.mxu0 %v244_v50 }
  0x44   : > { %562 = vmatpush.msrb.mxu3 %v273_v31  ;;  %352 = vmatmul.f32.gmra.mxu1 %v245_v51 }
  0x46   : > { %563 = vmatpush.msrb.mxu3 %v272_v33 }
  0x47   : > { %529 = vmatmul.msk.f32.gmra.mxu2 %vm368_vm0, %v232_v52 }
  0x48   : > { %564 = vmatpush.msrb.mxu3 %v271_v36 }
  0x4a   : > { %565 = vmatpush.msrb.mxu3 %v270_v38 }
  0x4b   : > { %361 = vmatmul.f32.vlgmr.msrb.gmra.mxu3 %v251_v53  ;;  %314 = vmatmul.f32.gmra.mxu0 %v246_v54 }
  0x4c   : > { %355 = vmatmul.f32.gmra.mxu1 %v247_v55 }
  0x4f   : > { %530 = vmatmul.msk.f32.gmra.mxu2 %vm368_vm0, %v233_v56 }
  0x53   : > { %364 = vmatmul.f32.gmra.mxu3 %v253_v57  ;;  %317 = vmatmul.f32.gmra.mxu0 %v248_v58 }
  0x54   : > { %358 = vmatmul.f32.gmra.mxu1 %v249_v59 }
  0x9a   : > { %v410_v60 = vpop.f32.mrf.mxu2 }
  0xa2   : > { %v413_v61 = vpop.f32.mrf.mxu2 }
  0xa8   : > { %v303_v62 = vpop.f32.mrf.mxu0 }
  0xa9   : > { %v344_v63 = vpop.f32.mrf.mxu1 }
  0xaa   : > { %v345_v0 = vadd.f32 %v344_v63, %v303_v62  ;;  %v416_v1 = vpop.f32.mrf.mxu2 }
  0xac   : > { %v411_v2 = vadd.f32 %v410_v60, %v345_v0 }
  0xae   : > { %435 = vst.msk [vmem:[%s824_s6] sm:$0xff] %vm434_vm1, %v411_v2 }
  0xb0   : > { %v306_v3 = vpop.f32.mrf.mxu0  ;;  %v321_v11 = vpop.f32.mrf.mxu3 }
  0xb1   : > { %v347_v4 = vpop.f32.mrf.mxu1 }
  0xb2   : > { %v348_v5 = vadd.f32 %v347_v4, %v306_v3  ;;  %v419_v6 = vpop.f32.mrf.mxu2 }
  0xb4   : > { %v414_v7 = vadd.f32 %v413_v61, %v348_v5 }
  0xb6   : > { %436 = vst.msk [vmem:[%s824_s6 + $0x8] sm:$0xff] %vm434_vm1, %v414_v7 }
  0xb8   : > { %v309_v8 = vpop.f32.mrf.mxu0  ;;  %v324_v19 = vpop.f32.mrf.mxu3 }
  0xb9   : > { %v350_v9 = vpop.f32.mrf.mxu1 }
  0xba   : > { %v351_v10 = vadd.f32 %v350_v9, %v309_v8  ;;  %v422_v12 = vpop.f32.mrf.mxu2 }
  0xbc   : > { %v417_v13 = vadd.f32 %v416_v1, %v351_v10 }
  0xbe   : > { %437 = vst.msk [vmem:[%s824_s6 + $0x10] sm:$0xff] %vm434_vm1, %v417_v13 }
  0xc0   : > { %v312_v14 = vpop.f32.mrf.mxu0 }
  0xc1   : > { %v353_v15 = vpop.f32.mrf.mxu1 }
  0xc2   : > { %v354_v16 = vadd.f32 %v353_v15, %v312_v14  ;;  %v425_v17 = vpop.f32.mrf.mxu2 }
  0xc4   : > { %v420_v18 = vadd.f32 %v419_v6, %v354_v16 }
  0xc6   : > { %438 = vst.msk [vmem:[%s824_s6 + $0x18] sm:$0xff] %vm434_vm1, %v420_v18 }
  0xc8   : > { %v315_v20 = vpop.f32.mrf.mxu0 }
  0xc9   : > { %v356_v21 = vpop.f32.mrf.mxu1 }
  0xca   : > { %v357_v22 = vadd.f32 %v356_v21, %v315_v20  ;;  %v428_v24 = vpop.f32.mrf.mxu2 }
  0xcc   : > { %v423_v23 = vadd.f32 %v422_v12, %v357_v22 }
  0xce   : > { %439 = vst.msk [vmem:[%s824_s6 + $0x20] sm:$0xff] %vm434_vm1, %v423_v23  ;;  %v362_v25 = vpop.f32.mrf.mxu3 }
  0xcf   : > { %v363_v26 = vadd.f32 %v362_v25, %v321_v11 }
  0xd0   : > { %v318_v27 = vpop.f32.mrf.mxu0 }
  0xd1   : > { %v429_v28 = vadd.f32 %v428_v24, %v363_v26  ;;  %v359_v29 = vpop.f32.mrf.mxu1 }
  0xd2   : > { %v360_v30 = vadd.f32 %v359_v29, %v318_v27  ;;  %v431_v33 = vpop.f32.mrf.mxu2 }
  0xd3   : > { %441 = vst.msk [vmem:[%s824_s6 + $0x30] sm:$0xff] %vm434_vm1, %v429_v28 }
  0xd4   : > { %v426_v31 = vadd.f32 %v425_v17, %v360_v30 }
  0xd6   : > { %440 = vst.msk [vmem:[%s824_s6 + $0x28] sm:$0xff] %vm434_vm1, %v426_v31  ;;  %v365_v32 = vpop.f32.mrf.mxu3 }
  0xd7   : > { %v366_v34 = vadd.f32 %v365_v32, %v324_v19 }
  0xd9   : > { %v432_v35 = vadd.f32 %v431_v33, %v366_v34 }
  0xdb   : > { %442 = vst.msk [vmem:[%s824_s6 + $0x38] sm:$0xff] %vm434_vm1, %v432_v35 }
  0xdc PF: > { %s14_s15 = sadd.s32 1, %s580_s15  }
  0xdd   : > { %p11_p4 = scmp.ge.s32.totalorder %s14_s15, 4  }
  0xdf   :  { %13 = sbr.rel (!%p11_p4) target bundleno = 1 (0x1), region = 69 }

</bundles_post_ra>
